<compile_context>
chip_gen: v5e
topology: v5e:2x2
jax: 0.10.0
libtpu: 0.0.40
codegen_flags: <defaults>
</compile_context>

<pallas_src>
import functools

import jax
import jax.numpy as jnp
from jax.experimental import pallas as pl
from jax.experimental.pallas import tpu as pltpu


def _round_up(x, m):
    return ((x + m - 1) // m) * m


def _choose_spatial_tile(m, cap):
    """Largest multiple-of-8 divisor of m that is <= cap (fallback: m)."""
    if m <= cap:
        return m
    for ts in range(cap, 7, -1):
        if m % ts == 0 and ts % 8 == 0:
            return ts
    return m


# ----------------------------------------------------------------------------
# Kernel 1: fused patch-embed conv + SiLU + global-average-pool.
#   grid = (B, num_spatial_tiles); batch axis "parallel", spatial axis is the
#   GAP reduction ("arbitrary"); pooled output block is resident across it.
#   The feature map only ever exists as a (ts, Cf) tile in vregs/VMEM.
# ----------------------------------------------------------------------------
def _conv_gap_kernel(x_ref, w_ref, b_ref, o_ref, *, inv_hw):
    s_idx = pl.program_id(1)

    @pl.when(s_idx == 0)
    def _():
        o_ref[...] = jnp.zeros_like(o_ref)

    # (ts, Kp) bf16 @ (Kp, Cf) bf16 -> (ts, Cf) f32 on the MXU.
    acc = jnp.dot(x_ref[...], w_ref[...], preferred_element_type=jnp.float32)
    acc = acc + b_ref[...]                     # bias broadcast, (1, Cf) f32
    act = acc * jax.nn.sigmoid(acc)            # SiLU (EUP logistic)

    # Partial column-sum for the GAP as a ones-vector MXU matmul
    # (keeps the cross-sublane reduce off the XLU).
    ones = jnp.ones((1, act.shape[0]), jnp.float32)
    o_ref[...] += jnp.dot(ones, act, preferred_element_type=jnp.float32)

    @pl.when(s_idx == pl.num_programs(1) - 1)
    def _():
        o_ref[...] = o_ref[...] * inv_hw       # sum -> mean


def conv_gap_fused(patches, conv_w, conv_b, *, spatial_tile=512):
    """patches: [B, Ho*Wo, Kp] bf16; conv_w: [Kp, Cf] bf16; conv_b: [1, Cf] f32.

    Returns pooled features [B, Cf] f32 = GAP(SiLU(patches @ conv_w + conv_b)).
    """
    B, M, Kp = patches.shape
    Cf = conv_w.shape[1]
    ts = _choose_spatial_tile(M, spatial_tile)
    n_s = M // ts

    out = pl.pallas_call(
        functools.partial(_conv_gap_kernel, inv_hw=1.0 / float(M)),
        out_shape=jax.ShapeDtypeStruct((B, 1, Cf), jnp.float32),
        grid_spec=pltpu.PrefetchScalarGridSpec(
            num_scalar_prefetch=0,
            grid=(B, n_s),
            in_specs=[
                # per-step patch tile (batch dim squeezed)
                pl.BlockSpec((None, ts, Kp), lambda bi, si: (bi, si, 0)),
                # conv weight / bias: constant block index -> fetched once, resident
                pl.BlockSpec((Kp, Cf), lambda bi, si: (0, 0)),
                pl.BlockSpec((1, Cf), lambda bi, si: (0, 0)),
            ],
            # same block across the spatial axis -> VMEM-resident accumulator
            out_specs=pl.BlockSpec((None, 1, Cf), lambda bi, si: (bi, 0, 0)),
        ),
        compiler_params=pltpu.CompilerParams(
            # batch axis shards across v7x's 2 TensorCores; spatial axis is the
            # GAP reduction and must stay "arbitrary".
            dimension_semantics=("parallel", "arbitrary"),
            # conservative scoped-VMEM budget: safe on v7x (64 MiB physical).
            vmem_limit_bytes=32 * 1024 * 1024,
        ),
    )(patches, conv_w, conv_b)
    return out.reshape(B, Cf)


# ----------------------------------------------------------------------------
# Kernel 2: fused MLP head  (Flatten -> Linear -> ReLU -> Linear -> ReLU).
#   Both matmuls in one launch; the [B, 256] intermediate never leaves VMEM.
#   Single whole-array block: operands are tiny (B is small, K<=384).
# ----------------------------------------------------------------------------
def _mlp_head_kernel(p_ref, w1_ref, b1_ref, w2_ref, b2_ref, z_ref):
    p = p_ref[...].astype(jnp.bfloat16)
    h1 = jnp.dot(p, w1_ref[...], preferred_element_type=jnp.float32) + b1_ref[...]
    h1 = jnp.maximum(h1, 0.0)
    h2 = jnp.dot(h1.astype(jnp.bfloat16), w2_ref[...],
                 preferred_element_type=jnp.float32) + b2_ref[...]
    # TODO(synk): nn.Dropout() applied as eval-mode identity; training-mode RNG
    # dropout is omitted.
    z_ref[...] = jnp.maximum(h2, 0.0).astype(z_ref.dtype)


def mlp_head(pooled, w1, b1, w2, b2):
    B, _ = pooled.shape
    out_dim = w2.shape[1]
    vmem = pl.BlockSpec(memory_space=pltpu.MemorySpace.VMEM)
    return pl.pallas_call(
        _mlp_head_kernel,
        out_shape=jax.ShapeDtypeStruct((B, out_dim), jnp.float32),
        in_specs=[vmem, vmem, vmem, vmem, vmem],
        out_specs=vmem,
        compiler_params=pltpu.CompilerParams(vmem_limit_bytes=32 * 1024 * 1024),
    )(pooled, w1, b1, w2, b2)


# ----------------------------------------------------------------------------
# Parameter init (deterministic, in-script; shapes follow the module)
# ----------------------------------------------------------------------------
def init_params(key, in_channels=3, feat_channels=384, hidden=256, out_dim=128,
                patch=2):
    k1, k2, k3, k4, k5, k6 = jax.random.split(key, 6)
    return {
        # stand-in backbone: patch-embed conv [ph, pw, Cin, Cf] (Cf=384 matches
        # efficientnet_b3's last feature map width -> LazyLinear(256) in_dim)
        "conv_w": jax.random.normal(k1, (patch, patch, in_channels, feat_channels),
                                    jnp.float32) * 0.05,
        "conv_b": jax.random.normal(k2, (feat_channels,), jnp.float32) * 0.01,
        # _l1: LazyLinear(256) materializes as [Cf, 256]
        "fc1_w": jax.random.normal(k3, (feat_channels, hidden), jnp.float32) * 0.05,
        "fc1_b": jax.random.normal(k4, (hidden,), jnp.float32) * 0.01,
        # Linear(256, out_dim)
        "fc2_w": jax.random.normal(k5, (hidden, out_dim), jnp.float32) * 0.05,
        "fc2_b": jax.random.normal(k6, (out_dim,), jnp.float32) * 0.01,
    }


# ----------------------------------------------------------------------------
# Forward pass (mirrors TimmModelBase.forward)
# ----------------------------------------------------------------------------
def timm_model_base_forward(params, x_nchw, *, spatial_tile=512):
    B, Cin, H, W = x_nchw.shape
    P = params["conv_w"].shape[0]
    assert H % P == 0 and W % P == 0, (H, W, P)
    Ho, Wo = H // P, W // P
    Cf = params["conv_w"].shape[-1]

    # --- patch extraction: NCHW -> [B, Ho*Wo, P*P*Cin] as ONE fused XLA
    # transpose/reshape/cast pass (no 9x im2col materialization; the
    # NCHW->NHWC transpose and the bf16 cast are folded into it).
    xp = x_nchw.astype(jnp.bfloat16).reshape(B, Cin, Ho, P, Wo, P)
    xp = jnp.transpose(xp, (0, 2, 4, 3, 5, 1))            # [B, Ho, Wo, pi, pj, Cin]
    K = P * P * Cin
    Kp = _round_up(K, 16)                                 # bf16 sublane-pack friendly
    patches = xp.reshape(B, Ho * Wo, K)
    patches = jnp.pad(patches, ((0, 0), (0, 0), (0, Kp - K)))  # zero-pad K (exact)

    conv_w = params["conv_w"].reshape(K, Cf)              # same (pi, pj, cin) order
    conv_w = jnp.pad(conv_w, ((0, Kp - K), (0, 0))).astype(jnp.bfloat16)
    conv_b = params["conv_b"].reshape(1, Cf).astype(jnp.float32)

    # --- backbone stand-in + self.gap, fused: feature map never leaves VMEM.
    pooled = conv_gap_fused(patches, conv_w, conv_b, spatial_tile=spatial_tile)

    # h exactly like AdaptiveAvgPool2d(1) on NCHW: [B, C, 1, 1]
    h = pooled.reshape(B, Cf, 1, 1)

    # --- z = self._l1(h): Flatten -> Linear+ReLU -> Linear+ReLU -> Dropout(id)
    z = mlp_head(
        pooled,
        params["fc1_w"].astype(jnp.bfloat16),
        params["fc1_b"].reshape(1, -1).astype(jnp.float32),
        params["fc2_w"].astype(jnp.bfloat16),
        params["fc2_b"].reshape(1, -1).astype(jnp.float32),
    )
    return h, z


# ----------------------------------------------------------------------------
if __name__ == "__main__":
    key = jax.random.PRNGKey(0)
    k_x, k_p = jax.random.split(key)
    x = jax.random.normal(k_x, (2, 3, 16, 16), jnp.float32)   # NCHW, like PyTorch
    params = init_params(k_p)

    # spatial_tile=32 -> 2 reduction steps over the 8x8=64 spatial positions,
    # exercising the resident-accumulator GAP path.
    fwd = jax.jit(functools.partial(timm_model_base_forward, spatial_tile=32))
    h, z = fwd(params, x)
    jax.block_until_ready((h, z))

    assert h.shape == (2, 384, 1, 1), h.shape
    assert z.shape == (2, 128), z.shape
    assert bool(jnp.all(jnp.isfinite(h))) and bool(jnp.all(jnp.isfinite(z)))
    print("KERNEL_OK")
</pallas_src>

<mosaic_0001>
module attributes {stable_mosaic.version = 11 : i64} {
  func.func @_conv_gap_kernel(%arg0: i32, %arg1: i32, %arg2: memref<1x32x16xbf16, #tpu.memory_space<vmem>>, %arg3: memref<16x384xbf16, #tpu.memory_space<vmem>>, %arg4: memref<1x384xf32, #tpu.memory_space<vmem>>, %arg5: memref<1x1x384xf32, #tpu.memory_space<vmem>>) attributes {dimension_semantics = [#tpu.dimension_semantics<parallel>, #tpu.dimension_semantics<arbitrary>], iteration_bounds = array<i64: 2, 2>, scalar_prefetch = 0 : i64, scratch_operands = 0 : i64, tpu.core_type = #tpu.core_type<tc>, window_params = [{transform_indices = @transform_0, window_bounds = array<i64: 1, 32, 16>}, {pipeline_mode = #tpu.pipeline_mode<synchronous>, transform_indices = @transform_1, window_bounds = array<i64: 16, 384>}, {pipeline_mode = #tpu.pipeline_mode<synchronous>, transform_indices = @transform_2, window_bounds = array<i64: 1, 384>}, {transform_indices = @transform_3, window_bounds = array<i64: 1, 1, 384>}]} {
    %c0_i32 = arith.constant 0 : i32
    %0 = arith.cmpi eq, %arg1, %c0_i32 : i32
    %1 = arith.extui %0 : i1 to i32
    %c0_i32_0 = arith.constant 0 : i32
    %2 = arith.cmpi ne, %1, %c0_i32_0 : i32
    scf.if %2 {
      %cst_17 = arith.constant 0.000000e+00 : f32
      %27 = vector.broadcast %cst_17 : f32 to vector<1x384xf32>
      %c0_18 = arith.constant 0 : index
      %c0_19 = arith.constant 0 : index
      %c0_20 = arith.constant 0 : index
      %28 = vector.load %arg5[%c0_18, %c0_19, %c0_20] : memref<1x1x384xf32, #tpu.memory_space<vmem>>, vector<1x1x384xf32>
      %29 = vector.shape_cast %28 : vector<1x1x384xf32> to vector<1x384xf32>
      %30 = vector.shape_cast %27 : vector<1x384xf32> to vector<1x1x384xf32>
      tpu.vector_store %arg5[%c0_18, %c0_19, %c0_20], %30 {strides = array<i32>} : memref<1x1x384xf32, #tpu.memory_space<vmem>>, vector<1x1x384xf32>,
    } else {
    }
    %c0 = arith.constant 0 : index
    %c0_1 = arith.constant 0 : index
    %c0_2 = arith.constant 0 : index
    %3 = vector.load %arg2[%c0, %c0_1, %c0_2] : memref<1x32x16xbf16, #tpu.memory_space<vmem>>, vector<1x32x16xbf16>
    %4 = vector.shape_cast %3 : vector<1x32x16xbf16> to vector<32x16xbf16>
    %c0_3 = arith.constant 0 : index
    %c0_4 = arith.constant 0 : index
    %5 = vector.load %arg3[%c0_3, %c0_4] : memref<16x384xbf16, #tpu.memory_space<vmem>>, vector<16x384xbf16>
    %cst = arith.constant dense<0.000000e+00> : vector<32x384xf32>
    %6 = tpu.matmul %4, %5, %cst {dimension_numbers = #tpu.dot_dimension_numbers<[1], [0], [0], [1], [0, 0, 1, 1], [], []>} : vector<32x16xbf16>, vector<16x384xbf16>, vector<32x384xf32> -> vector<32x384xf32>
    %c0_5 = arith.constant 0 : index
    %c0_6 = arith.constant 0 : index
    %7 = vector.load %arg4[%c0_5, %c0_6] : memref<1x384xf32, #tpu.memory_space<vmem>>, vector<1x384xf32>
    %8 = vector.broadcast %7 : vector<1x384xf32> to vector<32x384xf32>
    %9 = arith.addf %6, %8 : vector<32x384xf32>
    %10 = arith.negf %9 : vector<32x384xf32>
    %11 = math.exp %10 : vector<32x384xf32>
    %cst_7 = arith.constant 1.000000e+00 : f32
    %12 = vector.broadcast %cst_7 : f32 to vector<32x384xf32>
    %13 = arith.addf %12, %11 : vector<32x384xf32>
    %14 = arith.divf %12, %13 : vector<32x384xf32>
    %15 = arith.mulf %9, %14 : vector<32x384xf32>
    %cst_8 = arith.constant 1.000000e+00 : f32
    %16 = vector.broadcast %cst_8 : f32 to vector<1x32xf32>
    %c0_9 = arith.constant 0 : index
    %c0_10 = arith.constant 0 : index
    %c0_11 = arith.constant 0 : index
    %17 = vector.load %arg5[%c0_9, %c0_10, %c0_11] : memref<1x1x384xf32, #tpu.memory_space<vmem>>, vector<1x1x384xf32>
    %18 = vector.shape_cast %17 : vector<1x1x384xf32> to vector<1x384xf32>
    %cst_12 = arith.constant dense<0.000000e+00> : vector<1x384xf32>
    %19 = tpu.matmul %16, %15, %cst_12 {dimension_numbers = #tpu.dot_dimension_numbers<[1], [0], [0], [1], [0, 0, 1, 1], [], []>} : vector<1x32xf32>, vector<32x384xf32>, vector<1x384xf32> -> vector<1x384xf32>
    %20 = arith.addf %18, %19 : vector<1x384xf32>
    %c0_13 = arith.constant 0 : index
    %c0_14 = arith.constant 0 : index
    %c0_15 = arith.constant 0 : index
    %21 = vector.load %arg5[%c0_13, %c0_14, %c0_15] : memref<1x1x384xf32, #tpu.memory_space<vmem>>, vector<1x1x384xf32>
    %22 = vector.shape_cast %21 : vector<1x1x384xf32> to vector<1x384xf32>
    %23 = vector.shape_cast %20 : vector<1x384xf32> to vector<1x1x384xf32>
    tpu.vector_store %arg5[%c0_13, %c0_14, %c0_15], %23 {strides = array<i32>} : memref<1x1x384xf32, #tpu.memory_space<vmem>>, vector<1x1x384xf32>,
    %c1_i32 = arith.constant 1 : i32
    %24 = arith.cmpi eq, %arg1, %c1_i32 : i32
    %25 = arith.extui %24 : i1 to i32
    %c0_i32_16 = arith.constant 0 : i32
    %26 = arith.cmpi ne, %25, %c0_i32_16 : i32
    scf.if %26 {
      %c0_17 = arith.constant 0 : index
      %c0_18 = arith.constant 0 : index
      %c0_19 = arith.constant 0 : index
      %27 = vector.load %arg5[%c0_17, %c0_18, %c0_19] : memref<1x1x384xf32, #tpu.memory_space<vmem>>, vector<1x1x384xf32>
      %28 = vector.shape_cast %27 : vector<1x1x384xf32> to vector<1x384xf32>
      %cst_20 = arith.constant 1.562500e-02 : f32
      %29 = vector.broadcast %cst_20 : f32 to vector<1x384xf32>
      %30 = arith.mulf %28, %29 : vector<1x384xf32>
      %c0_21 = arith.constant 0 : index
      %c0_22 = arith.constant 0 : index
      %c0_23 = arith.constant 0 : index
      %31 = vector.load %arg5[%c0_21, %c0_22, %c0_23] : memref<1x1x384xf32, #tpu.memory_space<vmem>>, vector<1x1x384xf32>
      %32 = vector.shape_cast %31 : vector<1x1x384xf32> to vector<1x384xf32>
      %33 = vector.shape_cast %30 : vector<1x384xf32> to vector<1x1x384xf32>
      tpu.vector_store %arg5[%c0_21, %c0_22, %c0_23], %33 {strides = array<i32>} : memref<1x1x384xf32, #tpu.memory_space<vmem>>, vector<1x1x384xf32>,
    } else {
    }
    return
  }
  func.func @transform_0(%arg0: i32, %arg1: i32) -> (i32, i32, i32) {
    %c0_i32 = arith.constant 0 : i32
    %c0_i32_0 = arith.constant 0 : i32
    return %arg0, %arg1, %c0_i32 : i32, i32, i32
  }
  func.func @transform_1(%arg0: i32, %arg1: i32) -> (i32, i32) {
    %c0_i32 = arith.constant 0 : i32
    %c0_i32_0 = arith.constant 0 : i32
    %c0_i32_1 = arith.constant 0 : i32
    return %c0_i32, %c0_i32_0 : i32, i32
  }
  func.func @transform_2(%arg0: i32, %arg1: i32) -> (i32, i32) {
    %c0_i32 = arith.constant 0 : i32
    %c0_i32_0 = arith.constant 0 : i32
    %c0_i32_1 = arith.constant 0 : i32
    return %c0_i32, %c0_i32_0 : i32, i32
  }
  func.func @transform_3(%arg0: i32, %arg1: i32) -> (i32, i32, i32) {
    %c0_i32 = arith.constant 0 : i32
    %c0_i32_0 = arith.constant 0 : i32
    %c0_i32_1 = arith.constant 0 : i32
    return %arg0, %c0_i32, %c0_i32_0 : i32, i32, i32
  }
}

module attributes {stable_mosaic.version = 11 : i64} {
  func.func @_mlp_head_kernel(%arg0: memref<2x384xf32, #tpu.memory_space<vmem>>, %arg1: memref<384x256xbf16, #tpu.memory_space<vmem>>, %arg2: memref<1x256xf32, #tpu.memory_space<vmem>>, %arg3: memref<256x128xbf16, #tpu.memory_space<vmem>>, %arg4: memref<1x128xf32, #tpu.memory_space<vmem>>, %arg5: memref<2x128xf32, #tpu.memory_space<vmem>>) attributes {dimension_semantics = [], scalar_prefetch = 0 : i64, scratch_operands = 0 : i64, tpu.core_type = #tpu.core_type<tc>} {
    %c0 = arith.constant 0 : index
    %c0_0 = arith.constant 0 : index
    %0 = vector.load %arg0[%c0, %c0_0] : memref<2x384xf32, #tpu.memory_space<vmem>>, vector<2x384xf32>
    %1 = arith.truncf %0 : vector<2x384xf32> to vector<2x384xbf16>
    %c0_1 = arith.constant 0 : index
    %c0_2 = arith.constant 0 : index
    %2 = vector.load %arg1[%c0_1, %c0_2] : memref<384x256xbf16, #tpu.memory_space<vmem>>, vector<384x256xbf16>
    %cst = arith.constant dense<0.000000e+00> : vector<2x256xf32>
    %3 = tpu.matmul %1, %2, %cst {dimension_numbers = #tpu.dot_dimension_numbers<[1], [0], [0], [1], [0, 0, 1, 1], [], []>} : vector<2x384xbf16>, vector<384x256xbf16>, vector<2x256xf32> -> vector<2x256xf32>
    %c0_3 = arith.constant 0 : index
    %c0_4 = arith.constant 0 : index
    %4 = vector.load %arg2[%c0_3, %c0_4] : memref<1x256xf32, #tpu.memory_space<vmem>>, vector<1x256xf32>
    %5 = vector.broadcast %4 : vector<1x256xf32> to vector<2x256xf32>
    %6 = arith.addf %3, %5 : vector<2x256xf32>
    %cst_5 = arith.constant 0.000000e+00 : f32
    %7 = vector.broadcast %cst_5 : f32 to vector<2x256xf32>
    %8 = arith.maximumf %6, %7 : vector<2x256xf32>
    %9 = arith.truncf %8 : vector<2x256xf32> to vector<2x256xbf16>
    %c0_6 = arith.constant 0 : index
    %c0_7 = arith.constant 0 : index
    %10 = vector.load %arg3[%c0_6, %c0_7] : memref<256x128xbf16, #tpu.memory_space<vmem>>, vector<256x128xbf16>
    %cst_8 = arith.constant dense<0.000000e+00> : vector<2x128xf32>
    %11 = tpu.matmul %9, %10, %cst_8 {dimension_numbers = #tpu.dot_dimension_numbers<[1], [0], [0], [1], [0, 0, 1, 1], [], []>} : vector<2x256xbf16>, vector<256x128xbf16>, vector<2x128xf32> -> vector<2x128xf32>
    %c0_9 = arith.constant 0 : index
    %c0_10 = arith.constant 0 : index
    %12 = vector.load %arg4[%c0_9, %c0_10] : memref<1x128xf32, #tpu.memory_space<vmem>>, vector<1x128xf32>
    %13 = vector.broadcast %12 : vector<1x128xf32> to vector<2x128xf32>
    %14 = arith.addf %11, %13 : vector<2x128xf32>
    %cst_11 = arith.constant 0.000000e+00 : f32
    %15 = vector.broadcast %cst_11 : f32 to vector<2x128xf32>
    %16 = arith.maximumf %14, %15 : vector<2x128xf32>
    %c0_12 = arith.constant 0 : index
    %c0_13 = arith.constant 0 : index
    %17 = vector.load %arg5[%c0_12, %c0_13] : memref<2x128xf32, #tpu.memory_space<vmem>>, vector<2x128xf32>
    tpu.vector_store %arg5[%c0_12, %c0_13], %16 {strides = array<i32>} : memref<2x128xf32, #tpu.memory_space<vmem>>, vector<2x128xf32>,
    return
  }
}

</mosaic_0001>

<bundles_post_ra>
// kernel: timm_model_base_forward.2
= control target key start
LH: loop header
LB: loop body
LE: loop exit
PB: predicated region body
PF: predicated region fallthrough
CT: control target
= control target key end

     0   :  { %s922_s12 = smov 0   ;;  %s924_s13 = smov 0   ;;  %s1363_s0 = inlined_call_operand.vmem [shape: bf16[2,64,16], index: 0, kind: input, shape index: {}]   ;;  %s1364_s1 = inlined_call_operand.vmem [shape: bf16[16,384], index: 1, kind: input, shape index: {}]   ;;  %s1365_s2 = inlined_call_operand.vmem [shape: f32[1,384], index: 2, kind: input, shape index: {}]   ;;  %s1366_s3 = inlined_call_operand.vmem [shape: f32[2,1,384], index: 3, kind: output, shape index: {}]  }
   0x1   :  { %s926_s14 = smov 0   ;;  %s928_s15 = smov 0  }
   0x2   :  { %s930_s16 = smov 0  }
   0x3 LB: > { %s22_s17 = sadd.s32 1, %s890_s14  ;;  %s25_s18 = sadd.s32 1, %s894_s15  ;;  %s898_s16 = sphi %s930_s16, %s13_s16   ;;  %s894_s15 = sphi %s928_s15, %s1394_s15   ;;  %s890_s14 = sphi %s926_s14, %s1393_s14   ;;  %s886_s13 = sphi %s924_s13, %s1392_s13   ;;  %s882_s12 = sphi %s922_s12, %s1391_s12  }
   0x4   : > { %p23_p0 = scmp.ge.s32.totalorder %s22_s17, 2  ;;  %p715_p1 = scmp.ge.s32.totalorder %s898_s16, 1 }
   0x5   : > { %p156_p2 = scmp.lt.s32.totalorder %s898_s16, 5 }
   0x6   : > { %s1396_s17 = smov (%p23_p0, %s22_s17), 0  ;;  %s1398_s18 = smov (!%p23_p0, %s25_s18), %s894_s15 }
   0x7   : > { %p157_p3 = pnand %p715_p1, %p156_p2  ;;  %p27_p4 = scmp.ge.s32.totalorder %s1398_s18, 2 }
   0x8   : > { %s716_s19 = sshll.u32 (!%p157_p3), %s882_s12, 2  ;;  %p184_p5 = scmp.lt.s32.totalorder (!%p157_p3), %s886_s13, 1 }
   0x9   : > { %s1400_s18 = smov (%p27_p4, %s1398_s18), 0  ;;  %160 = sbr.rel (%p157_p3) target bundleno = 385 (0x181), region = 32 }
   0xa   : > { %p186_p6 = scmp.lt.s32.totalorder (!%p157_p3), %s716_s19, 7  ;;  %p719_p7 = scmp.ne.s32.totalorder (!%p157_p3), %s882_s12, 0 }
   0xe   : > { %s1402_s13 = smov (!%p184_p5, %s886_s13), 1  ;;  %s1404_s19 = smov (!%p186_p6, %s716_s19), 7 }
   0xf   : > { %s717_s20 = sshll.u32 %s1402_s13, 3  ;;  %s769_s21 = smul.u32 3, %s1402_s13 }
  0x10   : > { %s189_s22 = sadd.s32 %s717_s20, %s1404_s19  ;;  %201 = sbr.rel (%p719_p7) target bundleno = 25 (0x19), region = 36 }
  0x11   : > { %s718_s23 = sshll.u32 %s189_s22, 2  ;;  %s958_s26 = scalar_lea.vmem %s1366_s3, %s769_s21 }
  0x12   : > { %s191_s29 = scalar_lea.vmem %s1363_s0, %s718_s23 }
  0x15   : > { %v202_v0 = vlaneseq  ;;  %v900_v1 = vmov 0.0  }
  0x17   : > { %vm204_vm0 = vcmp.lt.s32.totalorder %v202_v0, 384 }
  0x18   : > { %206 = vst.msk [vmem:[%s958_s26] sm:$0x7] %vm204_vm0, %v900_v1 }
  0x19 PF: > { %v730_v2 = vld [vmem:[%s1364_s1] sm:$0xf]  ;;  %v767_v3 = vld [vmem:[%s1364_s1 + $0x8] sm:$0xf0]  ;;  %v766_v4 = vld [vmem:[%s1364_s1 + $0x4] sm:$0xf] }
  0x1a   : > { %v731_v5 = vor.u32 %v767_v3, %v730_v2  ;;  %v732_v6 = vld [vmem:[%s1364_s1 + $0xc] sm:$0xf0]  ;;  %v738_v7 = vld [vmem:[%s1364_s1 + $0x8] sm:$0xf]  ;;  %v768_v8 = vld [vmem:[%s1364_s1 + $0x10] sm:$0xf0] }
  0x1b   : > { %v735_v9 = vor.u32 %v766_v4, %v732_v6  ;;  %v739_v10 = vor.u32 %v768_v8, %v738_v7  ;;  %v764_v11 = vld [vmem:[%s191_s29] sm:$0xff]  ;;  %vm249_vm1 = vcmask 130048   ;;  %v765_v12 = vld [vmem:[%s191_s29 + $0x8] sm:$0xff]  ;;  %p761_p8 = scmp.ne.s32.totalorder %s882_s12, 1 }
  0x1c   : > { %263 = vmatpush.bf16.msra.mxu0 %v731_v5  ;;  %v215_v13 = vld [vmem:[%s1365_s2] sm:$0x7] }
  0x1d   : > { %282 = vmatpush.bf16.msra.mxu1 %v735_v9  ;;  %301 = vmatpush.bf16.msra.mxu2 %v739_v10  ;;  %v217_v14 = vperm.slane %v215_v13, 0  ;;  %v988_v18 = vperm.slane %v215_v13, 2  ;;  %v218_v23 = vperm.slane %v215_v13, 1 }
  0x1f   : > { %740 = vmatmul.msk.bf16.vlgmr.msra.gmra.mxu0 %vm249_vm1, %v764_v11 }
  0x20   : > { %742 = vmatmul.msk.bf16.vlgmr.msra.gmra.mxu1 %vm249_vm1, %v764_v11  ;;  %744 = vmatmul.msk.bf16.vlgmr.msra.gmra.mxu2 %vm249_vm1, %v764_v11 }
  0x2f   : > { %741 = vmatmul.msk.bf16.gmra.mxu0 %vm249_vm1, %v765_v12 }
  0x30   : > { %743 = vmatmul.msk.bf16.gmra.mxu1 %vm249_vm1, %v765_v12  ;;  %745 = vmatmul.msk.bf16.gmra.mxu2 %vm249_vm1, %v765_v12 }
  0x9c   : > { %v265_v15 = vpop.f32.mrf.mxu0 }
  0x9d   : > { %v284_v16 = vpop.f32.mrf.mxu1  ;;  %v986_v17 = vadd.f32 %v265_v15, %v217_v14 }
  0x9e   : > { %v998_v28 = vadd.f32 %v284_v16, %v218_v23 }
  0x9f   : > { %v746_v19 = vmul.f32 -1.442695, %v986_v17 }
  0xa0   : > { %v747_v33 = vmul.f32 -1.442695, %v998_v28 }
  0xa1   : > { %812 = vpow2.f32 %v746_v19 }
  0xa3   : > { %v303_v20 = vpop.f32.mrf.mxu2 }
  0xa4   : > { %v992_v21 = vadd.f32 %v303_v20, %v988_v18  ;;  %v267_v22 = vpop.f32.mrf.mxu0 }
  0xa5   : > { %v994_v24 = vadd.f32 %v267_v22, %v217_v14  ;;  %v286_v25 = vpop.f32.mrf.mxu1 }
  0xa6   : > { %v748_v26 = vmul.f32 -1.442695, %v992_v21  ;;  %v1006_v37 = vadd.f32 %v286_v25, %v218_v23 }
  0xa7   : > { %v749_v27 = vmul.f32 -1.442695, %v994_v24  ;;  %v813_v32 = vpop.eup %812 }
  0xa8   : > { %814 = vpow2.f32 %v748_v26  ;;  %v1012_v42 = vadd.f32 1.0, %v813_v32  ;;  %v750_v45 = vmul.f32 -1.442695, %v1006_v37 }
  0xa9   : > { %816 = vpow2.f32 %v749_v27 }
  0xaa   : > { %v372_v6 = vand.u32 2147483648, %v1012_v42  ;;  %v370_v16 = vand.u32 2147483647, %v1012_v42  ;;  %vm366_vm6 = vweird.f32 %v1012_v42 }
  0xab   : > { %v305_v29 = vpop.f32.mrf.mxu2 }
  0xac   : > { %v1001_v30 = vadd.f32 %v305_v29, %v988_v18  ;;  %v270_v31 = vpop.f32.mrf.mxu0  ;;  %v1069_v22 = vor.u32 1.1754944e-38, %v372_v6  ;;  %vm1175_vm15 = vcmp.eq.f32.partialorder %v370_v16, 8.507059e+37 }
  0xad   : > { %v1004_v34 = vadd.f32 %v270_v31, %v217_v14  ;;  %v289_v35 = vpop.f32.mrf.mxu1 }
  0xae   : > { %v815_v36 = vpop.eup %814  ;;  %v751_v38 = vmul.f32 -1.442695, %v1001_v30  ;;  %v1010_v41 = vadd.f32 %v289_v35, %v218_v23 }
  0xaf   : > { %v817_v39 = vpop.eup %816  ;;  %v752_v40 = vmul.f32 -1.442695, %v1004_v34  ;;  %v1016_v44 = vadd.f32 1.0, %v815_v36 }
  0xb0   : > { %v1014_v43 = vadd.f32 1.0, %v817_v39  ;;  %818 = vpow2.f32 %v751_v38  ;;  %v753_v46 = vmul.f32 -1.442695, %v1010_v41 }
  0xb1   : > { %820 = vpow2.f32 %v747_v33  ;;  %v402_v26 = vand.u32 2147483648, %v1016_v44 }
  0xb2   : > { %822 = vrcp.f32 %v1014_v43  ;;  %v417_v15 = vand.u32 2147483648, %v1014_v43  ;;  %v415_v19 = vand.u32 2147483647, %v1014_v43  ;;  %vm411_vm2 = vweird.f32 %v1014_v43 }
  0xb3   : > { %824 = vpow2.f32 %v752_v40  ;;  %v308_v47 = vpop.f32.mrf.mxu2 }
  0xb4   : > { %826 = vrcp.f32 %v1012_v42  ;;  %v1023_v48 = vadd.f32 %v308_v47, %v988_v18  ;;  %v272_v49 = vpop.f32.mrf.mxu0  ;;  %v418_v35 = vor.u32 1.1754944e-38, %v417_v15  ;;  %vm1092_vm3 = vcmp.eq.f32.partialorder %v415_v19, 8.507059e+37 }
  0xb5   : > { %828 = vrcp.f32 %v1016_v44  ;;  %v1026_v50 = vadd.f32 %v272_v49, %v217_v14  ;;  %v291_v51 = vpop.f32.mrf.mxu1 }
  0xb6   : > { %v819_v52 = vpop.eup %818  ;;  %830 = vpow2.f32 %v750_v45  ;;  %v754_v53 = vmul.f32 -1.442695, %v1023_v48  ;;  %v1029_v54 = vadd.f32 %v291_v51, %v218_v23 }
  0xb7   : > { %v821_v55 = vpop.eup %820  ;;  %v1031_v56 = vadd.f32 1.0, %v819_v52  ;;  %832 = vpow2.f32 %v753_v46  ;;  %v755_v57 = vmul.f32 -1.442695, %v1026_v50 }
  0xb8   : > { %v1034_v58 = vpop.eup %822  ;;  %834 = vpow2.f32 %v754_v53  ;;  %v756_v59 = vmul.f32 -1.442695, %v1029_v54  ;;  %v1044_v0 = vadd.f32 1.0, %v821_v55 }
  0xb9   : > { %v825_v60 = vpop.eup %824  ;;  %836 = vrcp.f32 %v1031_v56  ;;  %v407_v2 = vmul.f32 %v1034_v58, %v1014_v43  ;;  %v445_v51 = vand.u32 2147483647, %v1031_v56  ;;  %vm412_vm5 = vweird.f32 %v1034_v58 }
  0xba   : > { %v1038_v61 = vpop.eup %826  ;;  %v1040_v62 = vadd.f32 1.0, %v825_v60  ;;  %838 = vpow2.f32 %v755_v57  ;;  %vm1129_vm9 = vmor %vm411_vm2, %vm412_vm5 }
  0xbb   : > { %v1042_v63 = vpop.eup %828  ;;  %840 = vpow2.f32 %v756_v59  ;;  %v310_v1 = vpop.f32.mrf.mxu2  ;;  %v408_v13 = vsub.f32 1.0, %v407_v2  ;;  %v362_v20 = vmul.f32 %v1038_v61, %v1012_v42  ;;  %vm367_vm4 = vweird.f32 %v1038_v61 }
  0xbc   : > { %v831_v3 = vpop.eup %830  ;;  %842 = vrcp.f32 %v1040_v62  ;;  %v1050_v4 = vadd.f32 %v310_v1, %v988_v18  ;;  %v392_v8 = vmul.f32 %v1042_v63, %v1016_v44  ;;  %v460_v52 = vand.u32 2147483647, %v1040_v62  ;;  %vm1190_vm0 = vmor %vm366_vm6, %vm367_vm4 }
  0xbd   : > { %v833_v5 = vpop.eup %832  ;;  %844 = vrcp.f32 %v1044_v0  ;;  %v1059_v11 = vadd.f32 1.0, %v831_v3  ;;  %v409_v32 = vmul.f32 %v1034_v58, %v408_v13  ;;  %v363_v46 = vsub.f32 1.0, %v362_v20 }
  0xbe   : > { %v835_v7 = vpop.eup %834  ;;  %v757_v9 = vmul.f32 -1.442695, %v1050_v4  ;;  %v393_v25 = vsub.f32 1.0, %v392_v8  ;;  %v1083_v33 = vadd.f32 1.0, %v833_v5  ;;  %v447_v1 = vand.u32 2147483648, %v1031_v56 }
  0xbf   : > { %v1056_v10 = vpop.eup %836  ;;  %v1061_v12 = vadd.f32 1.0, %v835_v7  ;;  %v430_v36 = vand.u32 2147483647, %v1059_v11  ;;  %v432_v53 = vand.u32 2147483648, %v1059_v11  ;;  %v410_v60 = vadd.f32 %v1034_v58, %v409_v32 }
  0xc0   : > { %v839_v14 = vpop.eup %838  ;;  %846 = vpow2.f32 %v757_v9  ;;  %v437_v39 = vmul.f32 %v1056_v10, %v1031_v56  ;;  %v394_v49 = vmul.f32 %v1042_v63, %v393_v25  ;;  %v462_v3 = vand.u32 2147483648, %v1040_v62 }
  0xc1   : > { %v841_v18 = vpop.eup %840  ;;  %848 = vrcp.f32 %v1061_v12  ;;  %v1074_v27 = vadd.f32 1.0, %v839_v14  ;;  %vm456_vm7 = vweird.f32 %v1040_v62  ;;  %v364_v7 = vmul.f32 %v1038_v61, %v363_v46 }
  0xc2   : > { %v1071_v23 = vpop.eup %842  ;;  %850 = vrcp.f32 %v1059_v11  ;;  %v1078_v29 = vadd.f32 1.0, %v841_v18  ;;  %v438_v6 = vsub.f32 1.0, %v437_v39  ;;  %v1120_v9 = vadd.f32 %v1042_v63, %v394_v49 }
  0xc3   : > { %v452_v31 = vmul.f32 %v1071_v23, %v1040_v62  ;;  %852 = vrcp.f32 %v1074_v27  ;;  %v1087_v38 = vpop.eup %844  ;;  %v505_v13 = vand.u32 2147483647, %v1074_v27  ;;  %vm457_vm8 = vweird.f32 %v1071_v23 }
  0xc4   : > { %854 = vrcp.f32 %v1078_v29  ;;  %v507_v20 = vand.u32 2147483648, %v1074_v27  ;;  %vm1137_vm10 = vcmp.eq.f32.partialorder %v460_v52, 8.507059e+37  ;;  %v490_v43 = vand.u32 2147483647, %v1061_v12  ;;  %vm1152_vm12 = vmor %vm456_vm7, %vm457_vm8 }
  0xc5   : > { %v453_v40 = vsub.f32 1.0, %v452_v31  ;;  %856 = vrcp.f32 %v1083_v33  ;;  %v414_v31 = vsel %vm1129_vm9, %v1034_v58, %v410_v60  ;;  %v492_v39 = vand.u32 2147483648, %v1061_v12 }
  0xc6   : > { %v847_v47 = vpop.eup %846  ;;  %v1147_v46 = vmul.f32 %v1056_v10, %v438_v6  ;;  %vm501_vm11 = vweird.f32 %v1074_v27  ;;  %v365_v58 = vadd.f32 %v1038_v61, %v364_v7  ;;  %vm1159_vm13 = vcmp.eq.f32.partialorder %v505_v13, 8.507059e+37 }
  0xc7   : > { %v1101_v55 = vpop.eup %848  ;;  %v1103_v57 = vadd.f32 1.0, %v847_v47  ;;  %v454_v59 = vmul.f32 %v1071_v23, %v453_v40  ;;  %v463_v40 = vor.u32 1.1754944e-38, %v462_v3  ;;  %v508_v13 = vor.u32 1.1754944e-38, %v507_v20 }
  0xc8   : > { %v482_v2 = vmul.f32 %v1101_v55, %v1061_v12  ;;  %v1114_v5 = vpop.eup %850  ;;  %v369_v25 = vsel %vm1190_vm0, %v1038_v61, %v365_v58  ;;  %vm554_vm4 = vcmask 261120   ;;  %vm516_vm5 = vweird.f32 %v1078_v29 }
  0xc9   : > { %858 = vrcp.f32 %v1103_v57  ;;  %v853_v8 = vpop.eup %852  ;;  %v455_v14 = vadd.f32 %v1071_v23, %v454_v59  ;;  %v535_v6 = vand.u32 2147483647, %v1103_v57  ;;  %v537_v45 = vand.u32 2147483648, %v1103_v57 }
  0xca   : > { %v1133_v18 = vpop.eup %854  ;;  %v497_v19 = vmul.f32 %v853_v8, %v1074_v27  ;;  %v483_v32 = vsub.f32 1.0, %v482_v2  ;;  %v419_v2 = vsel %vm1092_vm3, %v418_v35, %v414_v31  ;;  %vm502_vm14 = vweird.f32 %v853_v8 }
  0xcb   : > { %v1157_v52 = vpop.eup %856  ;;  %v459_v60 = vsel %vm1152_vm12, %v1071_v23, %v455_v14  ;;  %v512_v62 = vmul.f32 %v1133_v18, %v1078_v29  ;;  %v544_v20 = vmul.f32 %v419_v2, %v994_v24  ;;  %vm503_vm1 = vmor %vm501_vm11, %vm502_vm14  ;;  %vm517_vm2 = vweird.f32 %v1133_v18 }
  0xcc   : > { %v498_v47 = vsub.f32 1.0, %v497_v19  ;;  %v484_v23 = vmul.f32 %v1101_v55, %v483_v32  ;;  %v464_v31 = vsel %vm1137_vm10, %v463_v40, %v459_v60  ;;  %v522_v32 = vand.u32 2147483648, %v1078_v29  ;;  %vm1217_vm9 = vmor %vm516_vm5, %vm517_vm2 }
  0xcd   : > { %v513_v14 = vsub.f32 1.0, %v512_v62  ;;  %v467_v24 = vmul.f32 %v1157_v52, %v1083_v33  ;;  %vm531_vm3 = vweird.f32 %v1103_v57  ;;  %v520_v27 = vand.u32 2147483647, %v1078_v29 }
  0xce   : > { %v499_v7 = vmul.f32 %v853_v8, %v498_v47  ;;  %vm486_vm6 = vweird.f32 %v1061_v12  ;;  %vm487_vm7 = vweird.f32 %v1101_v55  ;;  %v523_v2 = vor.u32 1.1754944e-38, %v522_v32 }
  0xcf   : > { %v1170_v3 = vpop.eup %858  ;;  %v514_v49 = vmul.f32 %v1133_v18, %v513_v14  ;;  %vm426_vm8 = vweird.f32 %v1059_v11  ;;  %vm471_vm10 = vweird.f32 %v1083_v33  ;;  %vm472_vm11 = vweird.f32 %v1157_v52 }
  0xd0   : > { %v527_v35 = vmul.f32 %v1170_v3, %v1103_v57  ;;  %v500_v19 = vadd.f32 %v853_v8, %v499_v7  ;;  %vm442_vm12 = vweird.f32 %v1056_v10  ;;  %v422_v7 = vmul.f32 %v1114_v5, %v1059_v11  ;;  %vm473_vm5 = vmor %vm471_vm10, %vm472_vm11 }
  0xd1   : > { %v515_v60 = vadd.f32 %v1133_v18, %v514_v49  ;;  %vm396_vm14 = vweird.f32 %v1016_v44  ;;  %vm397_vm0 = vweird.f32 %v1042_v63  ;;  %v485_v32 = vadd.f32 %v1101_v55, %v484_v23 }
  0xd2   : > { %v528_v47 = vsub.f32 1.0, %v527_v35  ;;  %v504_v42 = vsel %vm503_vm1, %v853_v8, %v500_v19  ;;  %v468_v8 = vsub.f32 1.0, %v467_v24  ;;  %v475_v35 = vand.u32 2147483647, %v1083_v33 }
  0xd3   : > { %v509_v40 = vsel %vm1159_vm13, %v508_v13, %v504_v42  ;;  %v519_v59 = vsel %vm1217_vm9, %v1133_v18, %v515_v60  ;;  %v547_v13 = vmul.f32 %v464_v31, %v1004_v34  ;;  %vm521_vm13 = vcmp.eq.f32.partialorder %v520_v27, 8.507059e+37 }
  0xd4   : > { %v529_v61 = vmul.f32 %v1170_v3, %v528_v47  ;;  %v550_v58 = vmul.f32 %v509_v40, %v1026_v50  ;;  %v469_v62 = vmul.f32 %v1157_v52, %v468_v8  ;;  %v477_v50 = vand.u32 2147483648, %v1083_v33 }
  0xd5   : > { %vm441_vm1 = vweird.f32 %v1031_v56  ;;  %v374_v18 = vsel %vm1175_vm15, %v1069_v22, %v369_v25  ;;  %v524_v14 = vsel %vm521_vm13, %v523_v2, %v519_v59  ;;  %v423_v16 = vsub.f32 1.0, %v422_v7 }
  0xd6   : > { %570 = vmatpush.msra.mxu3 %v550_v58  ;;  %v470_v19 = vadd.f32 %v1157_v52, %v469_v62  ;;  %v530_v34 = vadd.f32 %v1170_v3, %v529_v61  ;;  %vm532_vm2 = vweird.f32 %v1170_v3  ;;  %v377_v15 = vmul.f32 %v1087_v38, %v1044_v0 }
  0xd7   : > { %v478_v31 = vor.u32 1.1754944e-38, %v477_v50  ;;  %v424_v47 = vmul.f32 %v1114_v5, %v423_v16  ;;  %vm427_vm15 = vweird.f32 %v1114_v5  ;;  %v541_v23 = vmul.f32 %v374_v18, %v986_v17  ;;  %vm1256_vm10 = vmor %vm531_vm3, %vm532_vm2 }
  0xd8   : > { %571 = vmatpush.msra.mxu3 %v547_v13  ;;  %v474_v22 = vsel %vm473_vm5, %v1157_v52, %v470_v19  ;;  %v551_v49 = vmul.f32 %v524_v14, %v1029_v54  ;;  %vm476_vm9 = vcmp.eq.f32.partialorder %v475_v35, 8.507059e+37  ;;  %v378_v24 = vsub.f32 1.0, %v377_v15  ;;  %vm1266_vm11 = vmor %vm426_vm8, %vm427_vm15 }
  0xd9   : > { %v479_v42 = vsel %vm476_vm9, %v478_v31, %v474_v22  ;;  %v425_v52 = vadd.f32 %v1114_v5, %v424_v47  ;;  %v433_v25 = vor.u32 1.1754944e-38, %v432_v53  ;;  %vm381_vm3 = vweird.f32 %v1044_v0  ;;  %vm1289_vm2 = vmor %vm486_vm6, %vm487_vm7 }
  0xda   : > { %572 = vmatpush.msra.mxu3 %v544_v20  ;;  %v387_v20 = vand.u32 2147483648, %v1044_v0  ;;  %v379_v54 = vmul.f32 %v1087_v38, %v378_v24  ;;  %vm382_vm13 = vweird.f32 %v1087_v38  ;;  %v385_v27 = vand.u32 2147483647, %v1044_v0  ;;  %vm1312_vm5 = vmor %vm441_vm1, %vm442_vm12 }
  0xdb   : > { %v440_v53 = vadd.f32 %v1056_v10, %v1147_v46  ;;  %v534_v40 = vsel %vm1256_vm10, %v1170_v3, %v530_v34  ;;  %v901_v60 = vmov 1.0   ;;  %v429_v2 = vsel %vm1266_vm11, %v1114_v5, %v425_v52  ;;  %vm383_vm7 = vmor %vm381_vm3, %vm382_vm13 }
  0xdc   : > { %573 = vmatpush.msra.mxu3 %v541_v23  ;;  %vm431_vm8 = vcmp.eq.f32.partialorder %v430_v36, 8.507059e+37  ;;  %v538_v3 = vor.u32 1.1754944e-38, %v537_v45  ;;  %v548_v8 = vmul.f32 %v479_v42, %v1010_v41  ;;  %v380_v5 = vadd.f32 %v1087_v38, %v379_v54  ;;  %vm398_vm12 = vmor %vm396_vm14, %vm397_vm0 }
  0xdd   : > { %758 = vmatmul.msk.f32.vlgmr.msra.gmra.mxu3 %vm554_vm4, %v901_v60  ;;  %v434_v61 = vsel %vm431_vm8, %v433_v25, %v429_v2  ;;  %v489_v11 = vsel %vm1289_vm2, %v1101_v55, %v485_v32  ;;  %v493_v36 = vor.u32 1.1754944e-38, %v492_v39  ;;  %vm536_vm6 = vcmp.eq.f32.partialorder %v535_v6, 8.507059e+37 }
  0xde   : > { %590 = vmatpush.msrb.mxu3 %v551_v49  ;;  %v388_v45 = vor.u32 1.1754944e-38, %v387_v20  ;;  %v539_v55 = vsel %vm536_vm6, %v538_v3, %v534_v40  ;;  %v545_v39 = vmul.f32 %v434_v61, %v1006_v37  ;;  %v384_v57 = vsel %vm383_vm7, %v1087_v38, %v380_v5 }
  0xdf   : > { %vm386_vm15 = vcmp.eq.f32.partialorder %v385_v27, 8.507059e+37  ;;  %v400_v6 = vand.u32 2147483647, %v1016_v44  ;;  %v444_v0 = vsel %vm1312_vm5, %v1056_v10, %v440_v53  ;;  %vm491_vm9 = vcmp.eq.f32.partialorder %v490_v43, 8.507059e+37 }
  0xe0   : > { %591 = vmatpush.msrb.mxu3 %v548_v8  ;;  %v389_v58 = vsel %vm386_vm15, %v388_v45, %v384_v57  ;;  %v448_v37 = vor.u32 1.1754944e-38, %v447_v1  ;;  %v494_v38 = vsel %vm491_vm9, %v493_v36, %v489_v11  ;;  %v399_v59 = vsel %vm398_vm12, %v1042_v63, %v1120_v9 }
  0xe1   : > { %v542_v29 = vmul.f32 %v389_v58, %v998_v28  ;;  %vm446_vm1 = vcmp.eq.f32.partialorder %v445_v51, 8.507059e+37  ;;  %v552_v10 = vmul.f32 %v539_v55, %v1050_v4  ;;  %v403_v12 = vor.u32 1.1754944e-38, %v402_v26  ;;  %v553_v51 = vld [vmem:[%s958_s26] sm:$0x7] }
  0xe2   : > { %592 = vmatpush.msrb.mxu3 %v545_v39  ;;  %v449_v43 = vsel %vm446_vm1, %v448_v37, %v444_v0  ;;  %vm401_vm14 = vcmp.eq.f32.partialorder %v400_v6, 8.507059e+37  ;;  %v549_v1 = vmul.f32 %v494_v38, %v1023_v48  ;;  %vm623_vm0 = vcmask 1040384  }
  0xe3   : > { %v404_v62 = vsel %vm401_vm14, %v403_v12, %v399_v59  ;;  %v546_v28 = vmul.f32 %v449_v43, %v1001_v30  ;;  %v629_v48 = vlaneseq  ;;  %vm625_vm10 = vcmask 1041408  }
  0xe4   : > { %593 = vmatpush.msrb.mxu3 %v542_v29  ;;  %v543_v56 = vmul.f32 %v404_v62, %v992_v21 }
  0xe5   : > { %759 = vmatmul.msk.f32.vlgmr.msrb.gmra.mxu3 %vm554_vm4, %v901_v60  ;;  %vm631_vm11 = vcmp.lt.s32.totalorder %v629_v48, 384 }
  0xe6   : > { %610 = vmatpush.msra.mxu3 %v552_v10 }
  0xe8   : > { %611 = vmatpush.msra.mxu3 %v549_v1 }
  0xea   : > { %612 = vmatpush.msra.mxu3 %v546_v28 }
  0xec   : > { %613 = vmatpush.msra.mxu3 %v543_v56 }
  0xed   : > { %760 = vmatmul.msk.f32.vlgmr.msra.gmra.mxu3 %vm554_vm4, %v901_v60 }
 0x160   : > { %v575_v44 = vpop.f32.mrf.mxu3 }
 0x168   : > { %v595_v63 = vpop.f32.mrf.mxu3 }
 0x169   : > { %v621_v4 = vrot.slane %v595_v63, 7 }
 0x16b   : > { %v624_v50 = vsel %vm623_vm0, %v575_v44, %v621_v4 }
 0x170   : > { %v615_v26 = vpop.f32.mrf.mxu3 }
 0x171   : > { %v622_v9 = vrot.slane %v615_v26, 6 }
 0x172   : > { %637 = sbr.rel (%p761_p8) target bundleno = 385 (0x181), region = 40 }
 0x173   : > { %v626_v7 = vsel %vm625_vm10, %v624_v50, %v622_v9 }
 0x174   : > { %v628_v30 = vadd.f32 %v626_v7, %v553_v51 }
 0x176   : > { %633 = vst.msk [vmem:[%s958_s26] sm:$0x7] %vm631_vm11, %v628_v30 }
 0x17d   : > { %v638_v21 = vld [vmem:[%s958_s26] sm:$0x7] }
 0x17e   : > { %v639_v13 = vmul.f32 0.015625, %v638_v21 }
 0x180   : > { %640 = vst.msk [vmem:[%s958_s26] sm:$0x7] %vm631_vm11, %v639_v13 }
 0x181 PF: > { %s13_s16 = sadd.s32 1, %s898_s16   ;;  %s1391_s12 = smov %s890_s14 }
 0x182   : > { %p10_p9 = scmp.ge.s32.totalorder %s13_s16, 6   ;;  %s1392_s13 = smov %s894_s15 }
 0x183   : > { %s1393_s14 = smov %s1396_s17  ;;  %s1394_s15 = smov %s1400_s18 }
 0x184   :  { %12 = sbr.rel (!%p10_p9) target bundleno = 3 (0x3), region = 70 }

// kernel: timm_model_base_forward.3
= control target key start
LH: loop header
LB: loop body
LE: loop exit
PB: predicated region body
PF: predicated region fallthrough
CT: control target
= control target key end

     0   :  { %s1320_s0 = inlined_call_operand.vmem [shape: f32[2,384], index: 0, kind: input, shape index: {}]   ;;  %s1321_s1 = inlined_call_operand.vmem [shape: bf16[384,256], index: 1, kind: input, shape index: {}]   ;;  %s1322_s2 = inlined_call_operand.vmem [shape: f32[1,256], index: 2, kind: input, shape index: {}]   ;;  %s1323_s3 = inlined_call_operand.vmem [shape: bf16[256,128], index: 3, kind: input, shape index: {}]   ;;  %s1324_s4 = inlined_call_operand.vmem [shape: f32[1,128], index: 4, kind: input, shape index: {}]   ;;  %s1325_s5 = inlined_call_operand.hbm [shape: f32[2,128], index: 5, kind: output, shape index: {}]  }
   0x1   :  { %v643_v0 = vld [vmem:[%s1321_s1 + $0x70] sm:$0xf]  ;;  %v856_v1 = vld [vmem:[%s1321_s1 + $0x74] sm:$0xf0]  ;;  %v635_v9 = vld [vmem:[%s1321_s1 + $0x60] sm:$0xf] }
   0x2   :  { %v707_v2 = vld [vmem:[%s1321_s1 + $0xf0] sm:$0xf]  ;;  %v644_v3 = vor.u32 %v856_v1, %v643_v0  ;;  %v872_v4 = vld [vmem:[%s1321_s1 + $0xf4] sm:$0xf0]  ;;  %v854_v10 = vld [vmem:[%s1321_s1 + $0x64] sm:$0xf0] }
   0x3   :  { %v771_v5 = vld [vmem:[%s1321_s1 + $0x170] sm:$0xf]  ;;  %v888_v6 = vld [vmem:[%s1321_s1 + $0x174] sm:$0xf0]  ;;  %v708_v7 = vor.u32 %v872_v4, %v707_v2  ;;  %v699_v11 = vld [vmem:[%s1321_s1 + $0xe0] sm:$0xf]  ;;  %v636_v12 = vor.u32 %v854_v10, %v635_v9 }
   0x4   :  { %v772_v8 = vor.u32 %v888_v6, %v771_v5  ;;  %327 = vmatpush.bf16.msra.mxu0 %v644_v3  ;;  %v870_v13 = vld [vmem:[%s1321_s1 + $0xe4] sm:$0xf0]  ;;  %v763_v14 = vld [vmem:[%s1321_s1 + $0x160] sm:$0xf]  ;;  %v627_v18 = vld [vmem:[%s1321_s1 + $0x50] sm:$0xf] }
   0x5   :  { %v886_v15 = vld [vmem:[%s1321_s1 + $0x164] sm:$0xf0]  ;;  %340 = vmatpush.bf16.msra.mxu1 %v708_v7  ;;  %v700_v16 = vor.u32 %v870_v13, %v699_v11  ;;  %v852_v19 = vld [vmem:[%s1321_s1 + $0x54] sm:$0xf0]  ;;  %v691_v20 = vld [vmem:[%s1321_s1 + $0xd0] sm:$0xf] }
   0x6   :  { %353 = vmatpush.bf16.msra.mxu2 %v772_v8  ;;  %v764_v17 = vor.u32 %v886_v15, %v763_v14  ;;  %v868_v21 = vld [vmem:[%s1321_s1 + $0xd4] sm:$0xf0]  ;;  %v755_v22 = vld [vmem:[%s1321_s1 + $0x150] sm:$0xf]  ;;  %v628_v24 = vor.u32 %v852_v19, %v627_v18  ;;  %v855_v25 = vld [vmem:[%s1321_s1 + $0x74] sm:$0xf] }
   0x7   :  { %v884_v23 = vld [vmem:[%s1321_s1 + $0x154] sm:$0xf0]  ;;  %v645_v26 = vld [vmem:[%s1321_s1 + $0x78] sm:$0xf0]  ;;  %v692_v27 = vor.u32 %v868_v21, %v691_v20  ;;  %v619_v29 = vld [vmem:[%s1321_s1 + $0x40] sm:$0xf] }
   0x8   :  { %328 = vmatpush.bf16.msra.mxu0 %v636_v12  ;;  %v756_v28 = vor.u32 %v884_v23, %v755_v22  ;;  %v850_v30 = vld [vmem:[%s1321_s1 + $0x44] sm:$0xf0]  ;;  %v683_v31 = vld [vmem:[%s1321_s1 + $0xc0] sm:$0xf]  ;;  %v648_v32 = vor.u32 %v855_v25, %v645_v26  ;;  %v853_v36 = vld [vmem:[%s1321_s1 + $0x64] sm:$0xf] }
   0x9   :  { %341 = vmatpush.bf16.msra.mxu1 %v700_v16  ;;  %v866_v33 = vld [vmem:[%s1321_s1 + $0xc4] sm:$0xf0]  ;;  %v747_v34 = vld [vmem:[%s1321_s1 + $0x140] sm:$0xf]  ;;  %v637_v37 = vld [vmem:[%s1321_s1 + $0x68] sm:$0xf0]  ;;  %v620_v38 = vor.u32 %v850_v30, %v619_v29 }
   0xa   :  { %354 = vmatpush.bf16.msra.mxu2 %v764_v17  ;;  %v882_v35 = vld [vmem:[%s1321_s1 + $0x144] sm:$0xf0]  ;;  %366 = vmatpush.bf16.msra.mxu3 %v648_v32  ;;  %v611_v39 = vld [vmem:[%s1321_s1 + $0x30] sm:$0xf]  ;;  %v848_v40 = vld [vmem:[%s1321_s1 + $0x34] sm:$0xf0]  ;;  %v640_v41 = vor.u32 %v853_v36, %v637_v37  ;;  %v684_v42 = vor.u32 %v866_v33, %v683_v31 }
   0xb   :  { %v748_v43 = vor.u32 %v882_v35, %v747_v34  ;;  %v675_v44 = vld [vmem:[%s1321_s1 + $0xb0] sm:$0xf]  ;;  %v864_v45 = vld [vmem:[%s1321_s1 + $0xb4] sm:$0xf0]  ;;  %v851_v46 = vld [vmem:[%s1321_s1 + $0x54] sm:$0xf]  ;;  %v612_v51 = vor.u32 %v848_v40, %v611_v39 }
   0xc   :  { %329 = vmatpush.bf16.msra.mxu0 %v628_v24  ;;  %v739_v47 = vld [vmem:[%s1321_s1 + $0x130] sm:$0xf]  ;;  %v880_v48 = vld [vmem:[%s1321_s1 + $0x134] sm:$0xf0]  ;;  %v629_v49 = vld [vmem:[%s1321_s1 + $0x58] sm:$0xf0]  ;;  %v676_v54 = vor.u32 %v864_v45, %v675_v44 }
   0xd   :  { %342 = vmatpush.bf16.msra.mxu1 %v692_v27  ;;  %v632_v50 = vor.u32 %v851_v46, %v629_v49  ;;  %v849_v52 = vld [vmem:[%s1321_s1 + $0x44] sm:$0xf]  ;;  %v621_v53 = vld [vmem:[%s1321_s1 + $0x48] sm:$0xf0]  ;;  %v740_v55 = vor.u32 %v880_v48, %v739_v47  ;;  %v603_v56 = vld [vmem:[%s1321_s1 + $0x20] sm:$0xf] }
   0xe   :  { %355 = vmatpush.bf16.msra.mxu2 %v756_v28  ;;  %367 = vmatpush.bf16.msra.mxu3 %v640_v41  ;;  %v846_v57 = vld [vmem:[%s1321_s1 + $0x24] sm:$0xf0]  ;;  %v667_v58 = vld [vmem:[%s1321_s1 + $0xa0] sm:$0xf]  ;;  %v624_v62 = vor.u32 %v849_v52, %v621_v53  ;;  %v847_v0 = vld [vmem:[%s1321_s1 + $0x34] sm:$0xf] }
   0xf   :  { %v862_v59 = vld [vmem:[%s1321_s1 + $0xa4] sm:$0xf0]  ;;  %v731_v60 = vld [vmem:[%s1321_s1 + $0x120] sm:$0xf]  ;;  %v604_v63 = vor.u32 %v846_v57, %v603_v56  ;;  %v613_v1 = vld [vmem:[%s1321_s1 + $0x38] sm:$0xf0] }
  0x10   :  { %330 = vmatpush.bf16.msra.mxu0 %v620_v38  ;;  %v878_v61 = vld [vmem:[%s1321_s1 + $0x124] sm:$0xf0]  ;;  %v668_v2 = vor.u32 %v862_v59, %v667_v58  ;;  %v595_v4 = vld [vmem:[%s1321_s1 + $0x10] sm:$0xf]  ;;  %v844_v5 = vld [vmem:[%s1321_s1 + $0x14] sm:$0xf0]  ;;  %v616_v11 = vor.u32 %v847_v0, %v613_v1 }
  0x11   :  { %343 = vmatpush.bf16.msra.mxu1 %v684_v42  ;;  %v732_v3 = vor.u32 %v878_v61, %v731_v60  ;;  %v659_v6 = vld [vmem:[%s1321_s1 + $0x90] sm:$0xf]  ;;  %v860_v7 = vld [vmem:[%s1321_s1 + $0x94] sm:$0xf0]  ;;  %v587_v10 = vld [vmem:[%s1321_s1] sm:$0xf]  ;;  %v596_v13 = vor.u32 %v844_v5, %v595_v4 }
  0x12   :  { %356 = vmatpush.bf16.msra.mxu2 %v748_v43  ;;  %368 = vmatpush.bf16.msra.mxu3 %v632_v50  ;;  %v723_v8 = vld [vmem:[%s1321_s1 + $0x110] sm:$0xf]  ;;  %v876_v9 = vld [vmem:[%s1321_s1 + $0x114] sm:$0xf0]  ;;  %v21_v12 = vld [vmem:[%s1320_s0] sm:$0x3f]  ;;  %v660_v16 = vor.u32 %v860_v7, %v659_v6 }
  0x13   :  { %v845_v14 = vld [vmem:[%s1321_s1 + $0x24] sm:$0xf]  ;;  %v605_v15 = vld [vmem:[%s1321_s1 + $0x28] sm:$0xf0]  ;;  %23 = vst [vmem:[#allocation1] ss:$4 sm:$0xff] %v21_v12  ;;  %v724_v17 = vor.u32 %v876_v9, %v723_v8 }
  0x14   :  { %331 = vmatpush.bf16.msra.mxu0 %v612_v51  ;;  %v842_v18 = vld [vmem:[%s1321_s1 + $0x4] sm:$0xf0]  ;;  %v651_v19 = vld [vmem:[%s1321_s1 + $0x80] sm:$0xf]  ;;  %v871_v21 = vld [vmem:[%s1321_s1 + $0xf4] sm:$0xf]  ;;  %v608_v27 = vor.u32 %v845_v14, %v605_v15 }
  0x15   :  { %344 = vmatpush.bf16.msra.mxu1 %v676_v54  ;;  %v858_v20 = vld [vmem:[%s1321_s1 + $0x84] sm:$0xf0]  ;;  %v709_v22 = vld [vmem:[%s1321_s1 + $0xf8] sm:$0xf0]  ;;  %v887_v23 = vld [vmem:[%s1321_s1 + $0x174] sm:$0xf]  ;;  %v588_v28 = vor.u32 %v842_v18, %v587_v10 }
  0x16   :  { %357 = vmatpush.bf16.msra.mxu2 %v740_v55  ;;  %369 = vmatpush.bf16.msra.mxu3 %v624_v62  ;;  %v773_v24 = vld [vmem:[%s1321_s1 + $0x178] sm:$0xf0]  ;;  %v715_v25 = vld [vmem:[%s1321_s1 + $0x100] sm:$0xf]  ;;  %v874_v26 = vld [vmem:[%s1321_s1 + $0x104] sm:$0xf0]  ;;  %v652_v31 = vor.u32 %v858_v20, %v651_v19  ;;  %v712_v32 = vor.u32 %v871_v21, %v709_v22 }
  0x17   :  { %v843_v29 = vld [vmem:[%s1321_s1 + $0x14] sm:$0xf]  ;;  %v597_v30 = vld [vmem:[%s1321_s1 + $0x18] sm:$0xf0]  ;;  %v869_v33 = vld [vmem:[%s1321_s1 + $0xe4] sm:$0xf]  ;;  %v776_v35 = vor.u32 %v887_v23, %v773_v24  ;;  %v716_v36 = vor.u32 %v874_v26, %v715_v25 }
  0x18   :  { %332 = vmatpush.bf16.msra.mxu0 %v604_v63  ;;  %v701_v34 = vld [vmem:[%s1321_s1 + $0xe8] sm:$0xf0]  ;;  %v885_v37 = vld [vmem:[%s1321_s1 + $0x164] sm:$0xf]  ;;  %v600_v42 = vor.u32 %v843_v29, %v597_v30  ;;  %v867_v50 = vld [vmem:[%s1321_s1 + $0xd4] sm:$0xf] }
  0x19   :  { %345 = vmatpush.bf16.msra.mxu1 %v668_v2  ;;  %v765_v38 = vld [vmem:[%s1321_s1 + $0x168] sm:$0xf0]  ;;  %v841_v39 = vld [vmem:[%s1321_s1 + $0x4] sm:$0xf]  ;;  %v704_v46 = vor.u32 %v869_v33, %v701_v34  ;;  %v693_v51 = vld [vmem:[%s1321_s1 + $0xd8] sm:$0xf0] }
  0x1a   :  { %358 = vmatpush.bf16.msra.mxu2 %v732_v3  ;;  %370 = vmatpush.bf16.msra.mxu3 %v616_v11  ;;  %v26_v40 = vld.sshfl [vmem:[#allocation1 + $0x10] sm:$0xff pattern:$0x73625140]  ;;  %v24_v41 = vld.sshfl [vmem:[#allocation1] sm:$0xff pattern:$0x73625140]  ;;  %v768_v49 = vor.u32 %v885_v37, %v765_v38  ;;  %v696_v56 = vor.u32 %v867_v50, %v693_v51 }
  0x1b   :  { %v30_v43 = vpack.c.bf16 %v24_v41, %v24_v41  ;;  %v25_v44 = vld.sshfl [vmem:[#allocation1 + $0x8] sm:$0xff pattern:$0x73625140]  ;;  %v1183_v47 = vpack.c.bf16 %v26_v40, %v26_v40  ;;  %v883_v52 = vld [vmem:[%s1321_s1 + $0x154] sm:$0xf]  ;;  %v896_v55 = vld [vmem:[%s1323_s3 + $0x38] sm:$0xff] }
  0x1c   :  { %333 = vmatpush.bf16.msra.mxu0 %v596_v13  ;;  %v589_v45 = vld [vmem:[%s1321_s1 + $0x8] sm:$0xf0]  ;;  %v1185_v48 = vpack.c.bf16 %v25_v44, %v25_v44  ;;  %v757_v53 = vld [vmem:[%s1321_s1 + $0x158] sm:$0xf0] }
  0x1d   :  { %346 = vmatpush.bf16.msra.mxu1 %v660_v16  ;;  %v592_v54 = vor.u32 %v841_v39, %v589_v45 }
  0x1e   :  { %359 = vmatpush.bf16.msra.mxu2 %v724_v17  ;;  %371 = vmatpush.bf16.msra.mxu3 %v608_v27 }
  0x20   :  { %334 = vmatpush.bf16.msra.mxu0 %v588_v28 }
  0x21   :  { %347 = vmatpush.bf16.msra.mxu1 %v652_v31 }
  0x22   :  { %360 = vmatpush.bf16.msra.mxu2 %v716_v36  ;;  %372 = vmatpush.bf16.msra.mxu3 %v600_v42 }
  0x23   :  { %335 = vmatmul.bf16.vlgmr.msra.gmra.mxu0 %v30_v43 }
  0x24   :  { %379 = vmatpush.bf16.msrb.mxu0 %v712_v32  ;;  %348 = vmatmul.bf16.vlgmr.msra.gmra.mxu1 %v1185_v48 }
  0x25   :  { %392 = vmatpush.bf16.msrb.mxu1 %v776_v35  ;;  %361 = vmatmul.bf16.vlgmr.msra.gmra.mxu2 %v1183_v47 }
  0x28   :  { %380 = vmatpush.bf16.msrb.mxu0 %v704_v46 }
  0x29   :  { %10 = vsyncpa [#allocation3], 0  ;;  %393 = vmatpush.bf16.msrb.mxu1 %v768_v49  ;;  %v760_v57 = vor.u32 %v883_v52, %v757_v53  ;;  %v865_v58 = vld [vmem:[%s1321_s1 + $0xc4] sm:$0xf]  ;;  %v685_v59 = vld [vmem:[%s1321_s1 + $0xc8] sm:$0xf0]  ;;  %541 = vmatpush.bf16.msrb.mxu2 %v896_v55 }
  0x2a   :  { %373 = vmatpush.bf16.msra.mxu3 %v592_v54  ;;  %v881_v60 = vld [vmem:[%s1321_s1 + $0x144] sm:$0xf]  ;;  %v749_v61 = vld [vmem:[%s1321_s1 + $0x148] sm:$0xf0]  ;;  %v895_v62 = vld [vmem:[%s1323_s3 + $0x30] sm:$0xff]  ;;  %v688_v63 = vor.u32 %v865_v58, %v685_v59  ;;  %s933_s15 = smov [#allocation2]  }
  0x2b   :  { %v752_v0 = vor.u32 %v881_v60, %v749_v61  ;;  %v863_v1 = vld [vmem:[%s1321_s1 + $0xb4] sm:$0xf]  ;;  %v677_v2 = vld [vmem:[%s1321_s1 + $0xb8] sm:$0xf0]  ;;  %v894_v5 = vld [vmem:[%s1323_s3 + $0x28] sm:$0xff]  ;;  %s574_s16 = sshll.u32 %s933_s15, 4  ;;  %s575_s16 = int_to_ptr.vmem [resolvable:$true] %s574_s16 }
  0x2c   :  { %381 = vmatpush.bf16.msrb.mxu0 %v696_v56  ;;  %v879_v3 = vld [vmem:[%s1321_s1 + $0x134] sm:$0xf]  ;;  %v741_v4 = vld [vmem:[%s1321_s1 + $0x138] sm:$0xf0]  ;;  %v680_v6 = vor.u32 %v863_v1, %v677_v2  ;;  %v861_v8 = vld [vmem:[%s1321_s1 + $0xa4] sm:$0xf] }
  0x2d   :  { %394 = vmatpush.bf16.msrb.mxu1 %v760_v57  ;;  %374 = vmatmul.bf16.vlgmr.msra.gmra.mxu3 %v30_v43  ;;  %v744_v7 = vor.u32 %v879_v3, %v741_v4  ;;  %v669_v9 = vld [vmem:[%s1321_s1 + $0xa8] sm:$0xf0]  ;;  %v877_v10 = vld [vmem:[%s1321_s1 + $0x124] sm:$0xf]  ;;  %v859_v15 = vld [vmem:[%s1321_s1 + $0x94] sm:$0xf] }
  0x2e   :  { %542 = vmatpush.bf16.msrb.mxu2 %v895_v62  ;;  %v733_v11 = vld [vmem:[%s1321_s1 + $0x128] sm:$0xf0]  ;;  %v893_v12 = vld [vmem:[%s1323_s3 + $0x20] sm:$0xff]  ;;  %v672_v13 = vor.u32 %v861_v8, %v669_v9  ;;  %v661_v16 = vld [vmem:[%s1321_s1 + $0x98] sm:$0xf0]  ;;  %s576_s19 = sshll.u32 %s1325_s5, 4  ;;  %s577_s19 = int_to_ptr.hbm [resolvable:$true] %s576_s19 }
  0x2f   :  { %v736_v14 = vor.u32 %v877_v10, %v733_v11  ;;  %v875_v17 = vld [vmem:[%s1321_s1 + $0x114] sm:$0xf]  ;;  %v725_v18 = vld [vmem:[%s1321_s1 + $0x118] sm:$0xf0]  ;;  %v664_v20 = vor.u32 %v859_v15, %v661_v16  ;;  %v857_v22 = vld [vmem:[%s1321_s1 + $0x84] sm:$0xf] }
  0x30   :  { %382 = vmatpush.bf16.msrb.mxu0 %v688_v63  ;;  %v892_v19 = vld [vmem:[%s1323_s3 + $0x18] sm:$0xff]  ;;  %v728_v21 = vor.u32 %v875_v17, %v725_v18  ;;  %v653_v23 = vld [vmem:[%s1321_s1 + $0x88] sm:$0xf0]  ;;  %v873_v24 = vld [vmem:[%s1321_s1 + $0x104] sm:$0xf] }
  0x31   :  { %395 = vmatpush.bf16.msrb.mxu1 %v752_v0  ;;  %v717_v25 = vld [vmem:[%s1321_s1 + $0x108] sm:$0xf0]  ;;  %v656_v26 = vor.u32 %v857_v22, %v653_v23  ;;  %v891_v28 = vld [vmem:[%s1323_s3 + $0x10] sm:$0xff]  ;;  %v904_v29 = vld [vmem:[%s1323_s3 + $0x78] sm:$0xff] }
  0x32   :  { %543 = vmatpush.bf16.msrb.mxu2 %v894_v5  ;;  %v720_v27 = vor.u32 %v873_v24, %v717_v25  ;;  %554 = vmatpush.bf16.msrb.mxu3 %v904_v29  ;;  %v890_v30 = vld [vmem:[%s1323_s3 + $0x8] sm:$0xff]  ;;  %v903_v31 = vld [vmem:[%s1323_s3 + $0x70] sm:$0xff]  ;;  %v889_v32 = vld [vmem:[%s1323_s3] sm:$0xff] }
  0x33   :  { %v902_v33 = vld [vmem:[%s1323_s3 + $0x68] sm:$0xff]  ;;  %v901_v34 = vld [vmem:[%s1323_s3 + $0x60] sm:$0xff]  ;;  %v900_v35 = vld [vmem:[%s1323_s3 + $0x58] sm:$0xff] }
  0x34   :  { %383 = vmatpush.bf16.msrb.mxu0 %v680_v6  ;;  %v899_v36 = vld [vmem:[%s1323_s3 + $0x50] sm:$0xff]  ;;  %v81_v37 = vld [vmem:[%s1322_s2] sm:$0x3]  ;;  %v898_v39 = vld [vmem:[%s1323_s3 + $0x48] sm:$0xff] }
  0x35   :  { %396 = vmatpush.bf16.msrb.mxu1 %v744_v7  ;;  %v83_v38 = vperm.slane %v81_v37, 0  ;;  %v897_v43 = vld [vmem:[%s1323_s3 + $0x40] sm:$0xff]  ;;  %v84_v54 = vperm.slane %v81_v37, 1 }
  0x36   :  { %544 = vmatpush.bf16.msrb.mxu2 %v893_v12  ;;  %555 = vmatpush.bf16.msrb.mxu3 %v903_v31  ;;  %v906_v2 = vld [vmem:[%s1324_s4] ss:$0 sm:$0xff] }
  0x38   :  { %384 = vmatpush.bf16.msrb.mxu0 %v672_v13 }
  0x39   :  { %397 = vmatpush.bf16.msrb.mxu1 %v736_v14 }
  0x3a   :  { %545 = vmatpush.bf16.msrb.mxu2 %v892_v19  ;;  %556 = vmatpush.bf16.msrb.mxu3 %v902_v33 }
  0x3c   :  { %385 = vmatpush.bf16.msrb.mxu0 %v664_v20 }
  0x3d   :  { %398 = vmatpush.bf16.msrb.mxu1 %v728_v21 }
  0x3e   :  { %546 = vmatpush.bf16.msrb.mxu2 %v891_v28  ;;  %557 = vmatpush.bf16.msrb.mxu3 %v901_v34 }
  0x40   :  { %386 = vmatpush.bf16.msrb.mxu0 %v656_v26 }
  0x41   :  { %399 = vmatpush.bf16.msrb.mxu1 %v720_v27 }
  0x42   :  { %547 = vmatpush.bf16.msrb.mxu2 %v890_v30  ;;  %558 = vmatpush.bf16.msrb.mxu3 %v900_v35 }
  0x43   :  { %387 = vmatmul.bf16.vlgmr.msrb.gmra.mxu0 %v1185_v48 }
  0x44   :  { %400 = vmatmul.bf16.vlgmr.msrb.gmra.mxu1 %v1183_v47 }
  0x46   :  { %548 = vmatpush.bf16.msrb.mxu2 %v889_v32  ;;  %559 = vmatpush.bf16.msrb.mxu3 %v899_v36 }
  0x4a   :  { %560 = vmatpush.bf16.msrb.mxu3 %v898_v39 }
  0x4e   :  { %561 = vmatpush.bf16.msrb.mxu3 %v897_v43 }
  0xa0   :  { %v336_v40 = vpop.f32.mrf.mxu0 }
  0xa1   :  { %v337_v41 = vadd.f32 %v336_v40, %v83_v38  ;;  %v349_v42 = vpop.f32.mrf.mxu1 }
  0xa3   :  { %v350_v44 = vadd.f32 %v349_v42, %v337_v41 }
  0xa8   :  { %v362_v45 = vpop.f32.mrf.mxu2  ;;  %v338_v46 = vpop.f32.mrf.mxu0 }
  0xa9   :  { %v363_v47 = vadd.f32 %v362_v45, %v350_v44  ;;  %v351_v48 = vpop.f32.mrf.mxu1 }
  0xab   :  { %v405_v49 = vmax.f32 %v363_v47, 0.0 }
  0xad   :  { %v407_v50 = vpack.c.bf16 %v405_v49, %v405_v49 }
  0xaf   :  { %549 = vmatmul.bf16.vlgmr.msrb.gmra.mxu2 %v407_v50 }
  0xb0   :  { %v375_v51 = vpop.f32.mrf.mxu3  ;;  %v364_v52 = vpop.f32.mrf.mxu2 }
  0xb1   :  { %v376_v55 = vadd.f32 %v375_v51, %v84_v54 }
  0xb8   :  { %v377_v53 = vpop.f32.mrf.mxu3 }
  0xc0   :  { %v388_v56 = vpop.f32.mrf.mxu0 }
  0xc1   :  { %v389_v57 = vadd.f32 %v388_v56, %v376_v55  ;;  %v401_v58 = vpop.f32.mrf.mxu1 }
  0xc3   :  { %v402_v59 = vadd.f32 %v401_v58, %v389_v57 }
  0xc5   :  { %v406_v60 = vmax.f32 %v402_v59, 0.0 }
  0xc7   :  { %v408_v61 = vpack.c.bf16 %v406_v60, %v406_v60 }
  0xc8   :  { %v390_v62 = vpop.f32.mrf.mxu0 }
  0xc9   :  { %v403_v63 = vpop.f32.mrf.mxu1  ;;  %562 = vmatmul.bf16.vlgmr.msrb.gmra.mxu3 %v408_v61 }
 0x132   :  { %v550_v0 = vpop.f32.mrf.mxu2 }
 0x133   :  { %v551_v3 = vadd.f32 %v906_v2, %v550_v0 }
 0x13a   :  { %v552_v1 = vpop.f32.mrf.mxu2 }
 0x14c   :  { %v563_v4 = vpop.f32.mrf.mxu3 }
 0x14d   :  { %v564_v5 = vadd.f32 %v563_v4, %v551_v3 }
 0x14f   :  { %v567_v6 = vmax.f32 %v564_v5, 0.0 }
 0x151   :  { %568 = vst [vmem:[#allocation2] sm:$0x3] %v567_v6 }
 0x152   :  { %579 = dma.vmem_to_hbm [thread:$0]  %s575_s16, 32, %s577_s19, [#allocation3]  }
 0x154   :  { %v565_v7 = vpop.f32.mrf.mxu3 }
 0x155   :  { %931 = dma.done.wait [#allocation3], 32  }
 0x156   :  { %932 = vsyncadd [#allocation3], 4294967264 }
 0x157   :  { %584 = vsyncpa [#allocation3], 1 }

</bundles_post_ra>
